<compile_context>
chip_gen: v6e
topology: v6e:2x2x1
jax: 0.10.0
libtpu: 0.0.40
codegen_flags: <defaults>
</compile_context>

<pallas_src>
import functools
import math

import jax
import jax.numpy as jnp
from jax.experimental import pallas as pl
from jax.experimental.pallas import tpu as pltpu


def _round_up(n, m):
    return ((n + m - 1) // m) * m


# --------------------------------------------------------------------------- #
# In-kernel standard normal (hardware PRNG).  pltpu.prng_seed must be called
# before this.
# --------------------------------------------------------------------------- #
def _standard_normal(shape):
    if hasattr(pltpu, "stateful_normal"):
        return pltpu.stateful_normal(shape, jnp.float32)
    # Fallback for older builds: Irwin-Hall (sum of 12 uniforms - 6)
    # approximation of N(0,1) built from raw PRNG bits only.
    total = jnp.zeros(shape, jnp.float32)
    for _ in range(12):
        bits = pltpu.bitcast(pltpu.prng_random_bits(shape), jnp.uint32)
        u = (bits >> 8).astype(jnp.float32) * (1.0 / 16777216.0)   # [0, 1)
        total = total + u
    return total - 6.0


# --------------------------------------------------------------------------- #
# Kernel
# --------------------------------------------------------------------------- #
def _vae_fcl_kernel(
    noise_ref,                        # eps tile (VMEM f32) or PRNG seed (SMEM i32)
    x_ref,                            # (TB, input_dim) f32
    ew1, eb1, ew2, eb2,               # encoder Linear1 / Linear2 (bf16 W, f32 b)
    whead, bhead,                     # fused (Linear3 o [mu | log_var]) head
    dw1, db1, dw2, db2, dw3, db3,     # decoder Linear1/2/3
    xrec_ref, mu_ref, lv_ref,
    *, latent_dim, use_rng,
):
    cd = ew1.dtype                    # MXU compute dtype (bf16); accumulate f32

    # ---- encoder: Linear -> ReLU -> Linear -> ReLU (Dropout p=0.0 omitted) ----
    h = jnp.dot(x_ref[...].astype(cd), ew1[...],
                preferred_element_type=jnp.float32) + eb1[...]
    h = jnp.maximum(h, 0.0)
    h = jnp.dot(h.astype(cd), ew2[...],
                preferred_element_type=jnp.float32) + eb2[...]
    h = jnp.maximum(h, 0.0)

    # ---- fused head: one matmul producing [mu | log_var] ----
    head = jnp.dot(h.astype(cd), whead[...],
                   preferred_element_type=jnp.float32) + bhead[...]
    mu = head[:, :latent_dim]
    logvar = head[:, latent_dim:]

    # ---- reparametrize: z = mu + eps * exp(0.5 * log_var) ----
    if use_rng:
        pltpu.prng_seed(noise_ref[0] + pl.program_id(0))
        eps = _standard_normal(mu.shape)
    else:
        eps = noise_ref[...]
    z = mu + eps * jnp.exp(0.5 * logvar)

    # ---- decoder: Linear -> ReLU -> Linear -> ReLU -> Linear ----
    d = jnp.dot(z.astype(cd), dw1[...],
                preferred_element_type=jnp.float32) + db1[...]
    d = jnp.maximum(d, 0.0)
    d = jnp.dot(d.astype(cd), dw2[...],
                preferred_element_type=jnp.float32) + db2[...]
    d = jnp.maximum(d, 0.0)
    xrec = jnp.dot(d.astype(cd), dw3[...],
                   preferred_element_type=jnp.float32) + db3[...]

    xrec_ref[...] = xrec.astype(xrec_ref.dtype)
    mu_ref[...] = mu
    lv_ref[...] = logvar


# --------------------------------------------------------------------------- #
# Parameters
# --------------------------------------------------------------------------- #
def init_params(key, input_dim, hidden_dim_1, hidden_dim_2, latent_dim):
    """Synthetic parameters matching the nn.Linear layers.  Each Linear is
    stored as W: (in_features, out_features) and b: (1, out), i.e. the
    transpose of PyTorch's weight so forward is `x @ W + b`."""
    def linear(key, fan_in, fan_out):
        kw, kb = jax.random.split(key)
        bound = 1.0 / jnp.sqrt(float(fan_in))
        w = jax.random.uniform(kw, (fan_in, fan_out), jnp.float32, -bound, bound)
        b = jax.random.uniform(kb, (1, fan_out), jnp.float32, -bound, bound)
        return w, b

    keys = jax.random.split(key, 8)
    p = {}
    p["ew1"], p["eb1"] = linear(keys[0], input_dim, hidden_dim_1)
    p["ew2"], p["eb2"] = linear(keys[1], hidden_dim_1, hidden_dim_2)
    p["ew3"], p["eb3"] = linear(keys[2], hidden_dim_2, latent_dim)
    p["wmu"], p["bmu"] = linear(keys[3], latent_dim, latent_dim)
    p["wlv"], p["blv"] = linear(keys[4], latent_dim, latent_dim)
    p["dw1"], p["db1"] = linear(keys[5], latent_dim, hidden_dim_2)
    p["dw2"], p["db2"] = linear(keys[6], hidden_dim_2, hidden_dim_1)
    p["dw3"], p["db3"] = linear(keys[7], hidden_dim_1, input_dim)
    return p


def prepare_params(params, compute_dtype=jnp.bfloat16):
    """One-time prep: fold Linear3 into the mu/log_var heads (no nonlinearity
    between them) and cast matmul weights to the MXU compute dtype.  Biases
    stay f32 (added after the f32 accumulation).  No padding is needed —
    blocks equal to the full array dims are legal on TPU."""
    #   mu = (h @ W3 + b3) @ Wmu + bmu = h @ (W3 @ Wmu) + (b3 @ Wmu + bmu)
    wmu_f = params["ew3"] @ params["wmu"]
    wlv_f = params["ew3"] @ params["wlv"]
    bmu_f = params["eb3"] @ params["wmu"] + params["bmu"]
    blv_f = params["eb3"] @ params["wlv"] + params["blv"]
    return {
        "ew1": params["ew1"].astype(compute_dtype), "eb1": params["eb1"],
        "ew2": params["ew2"].astype(compute_dtype), "eb2": params["eb2"],
        "whead": jnp.concatenate([wmu_f, wlv_f], axis=1).astype(compute_dtype),
        "bhead": jnp.concatenate([bmu_f, blv_f], axis=1),
        "dw1": params["dw1"].astype(compute_dtype), "db1": params["db1"],
        "dw2": params["dw2"].astype(compute_dtype), "db2": params["db2"],
        "dw3": params["dw3"].astype(compute_dtype), "db3": params["db3"],
    }


# --------------------------------------------------------------------------- #
# Batch tiling / BlockSpec helpers
# --------------------------------------------------------------------------- #
_TB_CANDIDATES = (512, 448, 384, 320, 256, 192, 128, 96, 64, 48, 32, 16)


def _pick_batch_tiling(batch):
    """Return (padded_batch, tile_rows).  Small batches use one full-batch tile
    (block dim == array dim has no alignment constraint); larger batches use
    the largest 16-aligned tile dividing the (16-aligned) batch so the last
    tile is never mostly garbage."""
    if batch <= 512:
        return batch, batch
    for tb in _TB_CANDIDATES:
        if batch % tb == 0:
            return batch, tb
    bp = _round_up(batch, 16)
    for tb in _TB_CANDIDATES:
        if bp % tb == 0:
            return bp, tb
    return bp, 16


def _resident_spec(shape, buffers):
    """Whole-array weight block, VMEM-resident across all grid steps.
    Single-buffered when the JAX build supports pl.Buffered."""
    index_map = lambda i: (0,) * len(shape)
    if buffers == 1 and hasattr(pl, "Buffered"):
        try:
            return pl.BlockSpec(shape, index_map, pipeline_mode=pl.Buffered(1))
        except TypeError:  # older JAX without pipeline_mode kwarg
            pass
    return pl.BlockSpec(shape, index_map)


# --------------------------------------------------------------------------- #
# Forward wrapper
# --------------------------------------------------------------------------- #
@functools.partial(
    jax.jit,
    static_argnames=("seq_len", "num_channels", "latent_dim", "out_dtype",
                     "weight_buffers"))
def vae_fcl_forward(x, prep, *, eps=None, seed=None, seq_len, num_channels,
                    latent_dim, out_dtype=jnp.bfloat16, weight_buffers=1):
    """VAE_FCL.forward.  x: (B, seq_len, num_channels) f32.
    Provide exactly one of:
      eps : (B, latent_dim) f32 externally sampled N(0,1) (deterministic path)
      seed: int32 scalar for in-kernel hardware-PRNG eps sampling (fast path)
    Returns (x_recon (B, seq_len, num_channels) out_dtype, mu f32, log_var f32).
    """
    if (eps is None) == (seed is None):
        raise ValueError("provide exactly one of `eps` or `seed`")

    batch = x.shape[0]
    input_dim = seq_len * num_channels
    use_rng = eps is None

    B_P, TB = _pick_batch_tiling(batch)
    grid = (B_P // TB,)

    # x stays f32 in HBM and is cast to bf16 inside the kernel; no host-side
    # padding/relayout pass unless the batch is ragged w.r.t. the tile.
    x_flat = x.reshape(batch, input_dim)
    if B_P != batch:
        x_flat = jnp.pad(x_flat, ((0, B_P - batch), (0, 0)))

    if use_rng:
        noise = jnp.asarray(seed, dtype=jnp.int32).reshape((1,))
        noise_spec = pl.BlockSpec(memory_space=pltpu.MemorySpace.SMEM)
    else:
        noise = eps if B_P == batch else jnp.pad(eps, ((0, B_P - batch), (0, 0)))
        noise_spec = pl.BlockSpec((TB, latent_dim), lambda i: (i, 0))

    weight_keys = ("ew1", "eb1", "ew2", "eb2", "whead", "bhead",
                   "dw1", "db1", "dw2", "db2", "dw3", "db3")
    weights = tuple(prep[k] for k in weight_keys)

    in_specs = [noise_spec,
                pl.BlockSpec((TB, input_dim), lambda i: (i, 0))]
    in_specs += [_resident_spec(w.shape, weight_buffers) for w in weights]

    out_specs = (
        pl.BlockSpec((TB, input_dim), lambda i: (i, 0)),     # x_recon (bf16)
        pl.BlockSpec((TB, latent_dim), lambda i: (i, 0)),    # mu (f32)
        pl.BlockSpec((TB, latent_dim), lambda i: (i, 0)),    # log_var (f32)
    )
    out_shape = (
        jax.ShapeDtypeStruct((B_P, input_dim), out_dtype),
        jax.ShapeDtypeStruct((B_P, latent_dim), jnp.float32),
        jax.ShapeDtypeStruct((B_P, latent_dim), jnp.float32),
    )

    # Explicit VMEM budget with headroom (v7x: 64 MiB/TC, 32 MiB scoped default).
    def nbytes(shape, dtype):
        return math.prod(shape) * jnp.dtype(dtype).itemsize
    streamed = (2 * nbytes((TB, input_dim), jnp.float32)
                + (0 if use_rng else 2 * nbytes((TB, latent_dim), jnp.float32))
                + 2 * nbytes((TB, input_dim), out_dtype)
                + 4 * nbytes((TB, latent_dim), jnp.float32))
    resident = 2 * sum(w.size * jnp.dtype(w.dtype).itemsize for w in weights)
    vmem_limit = int(min(max(4 * (streamed + resident), 16 << 20), 64 << 20))

    kernel = functools.partial(_vae_fcl_kernel,
                               latent_dim=latent_dim, use_rng=use_rng)
    xrec_p, mu_p, lv_p = pl.pallas_call(
        kernel,
        out_shape=out_shape,
        grid=grid,
        in_specs=in_specs,
        out_specs=out_specs,
        compiler_params=pltpu.CompilerParams(
            dimension_semantics=("parallel",),   # batch tiles -> v7x's 2 TCs
            vmem_limit_bytes=vmem_limit),
    )(noise, x_flat, *weights)

    if B_P != batch:                              # ragged-batch tail only
        xrec_p, mu_p, lv_p = xrec_p[:batch], mu_p[:batch], lv_p[:batch]
    x_recon = xrec_p.reshape(batch, seq_len, num_channels)
    return x_recon, mu_p, lv_p


# --------------------------------------------------------------------------- #
# Pure-JAX references for validation
# --------------------------------------------------------------------------- #
def _reference_forward_f32(x, eps, params, seq_len, num_channels):
    """Full-precision f32 reference of the original module semantics."""
    b = x.shape[0]
    xf = x.reshape(b, -1)
    h = jnp.maximum(xf @ params["ew1"] + params["eb1"], 0.0)
    h = jnp.maximum(h @ params["ew2"] + params["eb2"], 0.0)
    res = h @ params["ew3"] + params["eb3"]
    mu = res @ params["wmu"] + params["bmu"]
    lv = res @ params["wlv"] + params["blv"]
    z = mu + eps * jnp.exp(0.5 * lv)
    d = jnp.maximum(z @ params["dw1"] + params["db1"], 0.0)
    d = jnp.maximum(d @ params["dw2"] + params["db2"], 0.0)
    xr = d @ params["dw3"] + params["db3"]
    return xr.reshape(b, seq_len, num_channels), mu, lv


def _reference_forward_matched(x, eps, prep, seq_len, num_channels, latent_dim):
    """Reference using the SAME fused/bf16 params and mixed-precision recipe."""
    b = x.shape[0]
    cd = prep["ew1"].dtype
    xf = x.reshape(b, -1).astype(cd)
    h = jnp.maximum(jnp.dot(xf, prep["ew1"], preferred_element_type=jnp.float32)
                    + prep["eb1"], 0.0)
    h = jnp.maximum(jnp.dot(h.astype(cd), prep["ew2"],
                            preferred_element_type=jnp.float32) + prep["eb2"], 0.0)
    head = jnp.dot(h.astype(cd), prep["whead"],
                   preferred_element_type=jnp.float32) + prep["bhead"]
    mu = head[:, :latent_dim]
    lv = head[:, latent_dim:]
    z = mu + eps * jnp.exp(0.5 * lv)
    d = jnp.maximum(jnp.dot(z.astype(cd), prep["dw1"],
                            preferred_element_type=jnp.float32) + prep["db1"], 0.0)
    d = jnp.maximum(jnp.dot(d.astype(cd), prep["dw2"],
                            preferred_element_type=jnp.float32) + prep["db2"], 0.0)
    xr = jnp.dot(d.astype(cd), prep["dw3"],
                 preferred_element_type=jnp.float32) + prep["db3"]
    return xr.reshape(b, seq_len, num_channels), mu, lv


# --------------------------------------------------------------------------- #
if __name__ == "__main__":
    batch, seq_len, num_channels = 8, 8, 4
    hidden_dim_1, hidden_dim_2, latent_dim = 64, 32, 16
    input_dim = seq_len * num_channels

    key = jax.random.PRNGKey(0)
    k_x, k_eps, k_params = jax.random.split(key, 3)
    x = jax.random.normal(k_x, (batch, seq_len, num_channels), jnp.float32)
    eps = jax.random.normal(k_eps, (batch, latent_dim), jnp.float32)

    params = init_params(k_params, input_dim, hidden_dim_1, hidden_dim_2, latent_dim)
    prep = prepare_params(params)

    fwd = functools.partial(vae_fcl_forward, seq_len=seq_len,
                            num_channels=num_channels, latent_dim=latent_dim)

    # --- deterministic path (eps supplied, mirrors torch.randn_like drawn outside)
    weight_buffers = 1
    try:
        x_recon, mu, logvar = fwd(x, prep, eps=eps, weight_buffers=weight_buffers)
        jax.block_until_ready((x_recon, mu, logvar))
    except Exception:
        # TODO(synk): this JAX build rejects single-buffered resident weights
        # (pl.Buffered(1)); fall back to default double buffering.
        weight_buffers = 2
        x_recon, mu, logvar = fwd(x, prep, eps=eps, weight_buffers=weight_buffers)
        jax.block_until_ready((x_recon, mu, logvar))

    assert x_recon.shape == (batch, seq_len, num_channels)
    assert mu.shape == (batch, latent_dim) and logvar.shape == (batch, latent_dim)

    # (1) Tight check vs a pure-JAX reference with the same fused/bf16 params.
    xr_m, mu_m, lv_m = _reference_forward_matched(
        x, eps, prep, seq_len, num_channels, latent_dim)
    assert jnp.allclose(mu, mu_m, atol=2e-3, rtol=2e-3)
    assert jnp.allclose(logvar, lv_m, atol=2e-3, rtol=2e-3)
    assert jnp.allclose(x_recon.astype(jnp.float32), xr_m, atol=1e-2, rtol=1e-2)

    # (2) Loose semantic check vs the full-precision f32 reference
    #     (differences are bf16-matmul / head-fold / bf16-output rounding only).
    xr_f, mu_f, lv_f = _reference_forward_f32(x, eps, params, seq_len, num_channels)
    assert jnp.allclose(mu, mu_f, atol=1e-1, rtol=1e-1)
    assert jnp.allclose(logvar, lv_f, atol=1e-1, rtol=1e-1)
    assert jnp.allclose(x_recon.astype(jnp.float32), xr_f, atol=1e-1, rtol=1e-1)

    # (3) In-kernel PRNG path: mu/log_var are eps-independent and must match;
    #     x_recon uses a fresh in-kernel eps draw, so only check finiteness.
    rng_ok = True
    try:
        xr_r, mu_r, lv_r = fwd(x, prep, seed=jnp.array(123, jnp.int32),
                               weight_buffers=weight_buffers)
        jax.block_until_ready((xr_r, mu_r, lv_r))
    except Exception:
        # TODO(synk): in-kernel PRNG eps sampling unavailable in this JAX build;
        # the externally-supplied-eps path above stays the validated default.
        rng_ok = False
    if rng_ok:
        assert jnp.allclose(mu_r, mu, atol=1e-5, rtol=1e-5)
        assert jnp.allclose(lv_r, logvar, atol=1e-5, rtol=1e-5)
        assert bool(jnp.all(jnp.isfinite(xr_r.astype(jnp.float32))))

    print("KERNEL_OK")
</pallas_src>

<mosaic_0001>
module attributes {stable_mosaic.version = 11 : i64} {
  func.func @_vae_fcl_kernel(%arg0: i32, %arg1: memref<8x16xf32, #tpu.memory_space<vmem>>, %arg2: memref<8x32xf32, #tpu.memory_space<vmem>>, %arg3: memref<32x64xbf16, #tpu.memory_space<vmem>>, %arg4: memref<1x64xf32, #tpu.memory_space<vmem>>, %arg5: memref<64x32xbf16, #tpu.memory_space<vmem>>, %arg6: memref<1x32xf32, #tpu.memory_space<vmem>>, %arg7: memref<32x32xbf16, #tpu.memory_space<vmem>>, %arg8: memref<1x32xf32, #tpu.memory_space<vmem>>, %arg9: memref<16x32xbf16, #tpu.memory_space<vmem>>, %arg10: memref<1x32xf32, #tpu.memory_space<vmem>>, %arg11: memref<32x64xbf16, #tpu.memory_space<vmem>>, %arg12: memref<1x64xf32, #tpu.memory_space<vmem>>, %arg13: memref<64x32xbf16, #tpu.memory_space<vmem>>, %arg14: memref<1x32xf32, #tpu.memory_space<vmem>>, %arg15: memref<8x32xbf16, #tpu.memory_space<vmem>>, %arg16: memref<8x16xf32, #tpu.memory_space<vmem>>, %arg17: memref<8x16xf32, #tpu.memory_space<vmem>>) attributes {dimension_semantics = [#tpu.dimension_semantics<parallel>], iteration_bounds = array<i64: 1>, scalar_prefetch = 0 : i64, scratch_operands = 0 : i64, tpu.core_type = #tpu.core_type<tc>, window_params = [{transform_indices = @transform_0, window_bounds = array<i64: 8, 16>}, {transform_indices = @transform_1, window_bounds = array<i64: 8, 32>}, {pipeline_mode = #tpu.pipeline_mode<synchronous>, transform_indices = @transform_2, window_bounds = array<i64: 32, 64>}, {pipeline_mode = #tpu.pipeline_mode<synchronous>, transform_indices = @transform_3, window_bounds = array<i64: 1, 64>}, {pipeline_mode = #tpu.pipeline_mode<synchronous>, transform_indices = @transform_4, window_bounds = array<i64: 64, 32>}, {pipeline_mode = #tpu.pipeline_mode<synchronous>, transform_indices = @transform_5, window_bounds = array<i64: 1, 32>}, {pipeline_mode = #tpu.pipeline_mode<synchronous>, transform_indices = @transform_6, window_bounds = array<i64: 32, 32>}, {pipeline_mode = #tpu.pipeline_mode<synchronous>, transform_indices = @transform_7, window_bounds = array<i64: 1, 32>}, {pipeline_mode = #tpu.pipeline_mode<synchronous>, transform_indices = @transform_8, window_bounds = array<i64: 16, 32>}, {pipeline_mode = #tpu.pipeline_mode<synchronous>, transform_indices = @transform_9, window_bounds = array<i64: 1, 32>}, {pipeline_mode = #tpu.pipeline_mode<synchronous>, transform_indices = @transform_10, window_bounds = array<i64: 32, 64>}, {pipeline_mode = #tpu.pipeline_mode<synchronous>, transform_indices = @transform_11, window_bounds = array<i64: 1, 64>}, {pipeline_mode = #tpu.pipeline_mode<synchronous>, transform_indices = @transform_12, window_bounds = array<i64: 64, 32>}, {pipeline_mode = #tpu.pipeline_mode<synchronous>, transform_indices = @transform_13, window_bounds = array<i64: 1, 32>}, {transform_indices = @transform_14, window_bounds = array<i64: 8, 32>}, {transform_indices = @transform_15, window_bounds = array<i64: 8, 16>}, {transform_indices = @transform_16, window_bounds = array<i64: 8, 16>}]} {
    %c0 = arith.constant 0 : index
    %c0_0 = arith.constant 0 : index
    %0 = vector.load %arg2[%c0, %c0_0] : memref<8x32xf32, #tpu.memory_space<vmem>>, vector<8x32xf32>
    %1 = arith.truncf %0 : vector<8x32xf32> to vector<8x32xbf16>
    %c0_1 = arith.constant 0 : index
    %c0_2 = arith.constant 0 : index
    %2 = vector.load %arg3[%c0_1, %c0_2] : memref<32x64xbf16, #tpu.memory_space<vmem>>, vector<32x64xbf16>
    %cst = arith.constant dense<0.000000e+00> : vector<8x64xf32>
    %3 = tpu.matmul %1, %2, %cst {dimension_numbers = #tpu.dot_dimension_numbers<[1], [0], [0], [1], [0, 0, 1, 1], [], []>} : vector<8x32xbf16>, vector<32x64xbf16>, vector<8x64xf32> -> vector<8x64xf32>
    %c0_3 = arith.constant 0 : index
    %c0_4 = arith.constant 0 : index
    %4 = vector.load %arg4[%c0_3, %c0_4] : memref<1x64xf32, #tpu.memory_space<vmem>>, vector<1x64xf32>
    %5 = vector.broadcast %4 : vector<1x64xf32> to vector<8x64xf32>
    %6 = arith.addf %3, %5 : vector<8x64xf32>
    %cst_5 = arith.constant 0.000000e+00 : f32
    %7 = vector.broadcast %cst_5 : f32 to vector<8x64xf32>
    %8 = arith.maximumf %6, %7 : vector<8x64xf32>
    %9 = arith.truncf %8 : vector<8x64xf32> to vector<8x64xbf16>
    %c0_6 = arith.constant 0 : index
    %c0_7 = arith.constant 0 : index
    %10 = vector.load %arg5[%c0_6, %c0_7] : memref<64x32xbf16, #tpu.memory_space<vmem>>, vector<64x32xbf16>
    %cst_8 = arith.constant dense<0.000000e+00> : vector<8x32xf32>
    %11 = tpu.matmul %9, %10, %cst_8 {dimension_numbers = #tpu.dot_dimension_numbers<[1], [0], [0], [1], [0, 0, 1, 1], [], []>} : vector<8x64xbf16>, vector<64x32xbf16>, vector<8x32xf32> -> vector<8x32xf32>
    %c0_9 = arith.constant 0 : index
    %c0_10 = arith.constant 0 : index
    %12 = vector.load %arg6[%c0_9, %c0_10] : memref<1x32xf32, #tpu.memory_space<vmem>>, vector<1x32xf32>
    %13 = vector.broadcast %12 : vector<1x32xf32> to vector<8x32xf32>
    %14 = arith.addf %11, %13 : vector<8x32xf32>
    %cst_11 = arith.constant 0.000000e+00 : f32
    %15 = vector.broadcast %cst_11 : f32 to vector<8x32xf32>
    %16 = arith.maximumf %14, %15 : vector<8x32xf32>
    %17 = arith.truncf %16 : vector<8x32xf32> to vector<8x32xbf16>
    %c0_12 = arith.constant 0 : index
    %c0_13 = arith.constant 0 : index
    %18 = vector.load %arg7[%c0_12, %c0_13] : memref<32x32xbf16, #tpu.memory_space<vmem>>, vector<32x32xbf16>
    %cst_14 = arith.constant dense<0.000000e+00> : vector<8x32xf32>
    %19 = tpu.matmul %17, %18, %cst_14 {dimension_numbers = #tpu.dot_dimension_numbers<[1], [0], [0], [1], [0, 0, 1, 1], [], []>} : vector<8x32xbf16>, vector<32x32xbf16>, vector<8x32xf32> -> vector<8x32xf32>
    %c0_15 = arith.constant 0 : index
    %c0_16 = arith.constant 0 : index
    %20 = vector.load %arg8[%c0_15, %c0_16] : memref<1x32xf32, #tpu.memory_space<vmem>>, vector<1x32xf32>
    %21 = vector.broadcast %20 : vector<1x32xf32> to vector<8x32xf32>
    %22 = arith.addf %19, %21 : vector<8x32xf32>
    %23 = vector.extract_strided_slice %22 {offsets = [0, 0], sizes = [8, 16], strides = [1, 1]} : vector<8x32xf32> to vector<8x16xf32>
    %24 = vector.extract_strided_slice %22 {offsets = [0, 16], sizes = [8, 16], strides = [1, 1]} : vector<8x32xf32> to vector<8x16xf32>
    %c0_17 = arith.constant 0 : index
    %c0_18 = arith.constant 0 : index
    %25 = vector.load %arg1[%c0_17, %c0_18] : memref<8x16xf32, #tpu.memory_space<vmem>>, vector<8x16xf32>
    %cst_19 = arith.constant 5.000000e-01 : f32
    %26 = vector.broadcast %cst_19 : f32 to vector<8x16xf32>
    %27 = arith.mulf %26, %24 : vector<8x16xf32>
    %28 = math.exp %27 : vector<8x16xf32>
    %29 = arith.mulf %25, %28 : vector<8x16xf32>
    %30 = arith.addf %23, %29 : vector<8x16xf32>
    %31 = arith.truncf %30 : vector<8x16xf32> to vector<8x16xbf16>
    %c0_20 = arith.constant 0 : index
    %c0_21 = arith.constant 0 : index
    %32 = vector.load %arg9[%c0_20, %c0_21] : memref<16x32xbf16, #tpu.memory_space<vmem>>, vector<16x32xbf16>
    %cst_22 = arith.constant dense<0.000000e+00> : vector<8x32xf32>
    %33 = tpu.matmul %31, %32, %cst_22 {dimension_numbers = #tpu.dot_dimension_numbers<[1], [0], [0], [1], [0, 0, 1, 1], [], []>} : vector<8x16xbf16>, vector<16x32xbf16>, vector<8x32xf32> -> vector<8x32xf32>
    %c0_23 = arith.constant 0 : index
    %c0_24 = arith.constant 0 : index
    %34 = vector.load %arg10[%c0_23, %c0_24] : memref<1x32xf32, #tpu.memory_space<vmem>>, vector<1x32xf32>
    %35 = vector.broadcast %34 : vector<1x32xf32> to vector<8x32xf32>
    %36 = arith.addf %33, %35 : vector<8x32xf32>
    %cst_25 = arith.constant 0.000000e+00 : f32
    %37 = vector.broadcast %cst_25 : f32 to vector<8x32xf32>
    %38 = arith.maximumf %36, %37 : vector<8x32xf32>
    %39 = arith.truncf %38 : vector<8x32xf32> to vector<8x32xbf16>
    %c0_26 = arith.constant 0 : index
    %c0_27 = arith.constant 0 : index
    %40 = vector.load %arg11[%c0_26, %c0_27] : memref<32x64xbf16, #tpu.memory_space<vmem>>, vector<32x64xbf16>
    %cst_28 = arith.constant dense<0.000000e+00> : vector<8x64xf32>
    %41 = tpu.matmul %39, %40, %cst_28 {dimension_numbers = #tpu.dot_dimension_numbers<[1], [0], [0], [1], [0, 0, 1, 1], [], []>} : vector<8x32xbf16>, vector<32x64xbf16>, vector<8x64xf32> -> vector<8x64xf32>
    %c0_29 = arith.constant 0 : index
    %c0_30 = arith.constant 0 : index
    %42 = vector.load %arg12[%c0_29, %c0_30] : memref<1x64xf32, #tpu.memory_space<vmem>>, vector<1x64xf32>
    %43 = vector.broadcast %42 : vector<1x64xf32> to vector<8x64xf32>
    %44 = arith.addf %41, %43 : vector<8x64xf32>
    %cst_31 = arith.constant 0.000000e+00 : f32
    %45 = vector.broadcast %cst_31 : f32 to vector<8x64xf32>
    %46 = arith.maximumf %44, %45 : vector<8x64xf32>
    %47 = arith.truncf %46 : vector<8x64xf32> to vector<8x64xbf16>
    %c0_32 = arith.constant 0 : index
    %c0_33 = arith.constant 0 : index
    %48 = vector.load %arg13[%c0_32, %c0_33] : memref<64x32xbf16, #tpu.memory_space<vmem>>, vector<64x32xbf16>
    %cst_34 = arith.constant dense<0.000000e+00> : vector<8x32xf32>
    %49 = tpu.matmul %47, %48, %cst_34 {dimension_numbers = #tpu.dot_dimension_numbers<[1], [0], [0], [1], [0, 0, 1, 1], [], []>} : vector<8x64xbf16>, vector<64x32xbf16>, vector<8x32xf32> -> vector<8x32xf32>
    %c0_35 = arith.constant 0 : index
    %c0_36 = arith.constant 0 : index
    %50 = vector.load %arg14[%c0_35, %c0_36] : memref<1x32xf32, #tpu.memory_space<vmem>>, vector<1x32xf32>
    %51 = vector.broadcast %50 : vector<1x32xf32> to vector<8x32xf32>
    %52 = arith.addf %49, %51 : vector<8x32xf32>
    %53 = arith.truncf %52 : vector<8x32xf32> to vector<8x32xbf16>
    %c0_37 = arith.constant 0 : index
    %c0_38 = arith.constant 0 : index
    %54 = vector.load %arg15[%c0_37, %c0_38] : memref<8x32xbf16, #tpu.memory_space<vmem>>, vector<8x32xbf16>
    tpu.vector_store %arg15[%c0_37, %c0_38], %53 {strides = array<i32>} : memref<8x32xbf16, #tpu.memory_space<vmem>>, vector<8x32xbf16>,
    %c0_39 = arith.constant 0 : index
    %c0_40 = arith.constant 0 : index
    %55 = vector.load %arg16[%c0_39, %c0_40] : memref<8x16xf32, #tpu.memory_space<vmem>>, vector<8x16xf32>
    tpu.vector_store %arg16[%c0_39, %c0_40], %23 {strides = array<i32>} : memref<8x16xf32, #tpu.memory_space<vmem>>, vector<8x16xf32>,
    %c0_41 = arith.constant 0 : index
    %c0_42 = arith.constant 0 : index
    %56 = vector.load %arg17[%c0_41, %c0_42] : memref<8x16xf32, #tpu.memory_space<vmem>>, vector<8x16xf32>
    tpu.vector_store %arg17[%c0_41, %c0_42], %24 {strides = array<i32>} : memref<8x16xf32, #tpu.memory_space<vmem>>, vector<8x16xf32>,
    return
  }
  func.func @transform_0(%arg0: i32) -> (i32, i32) {
    %c0_i32 = arith.constant 0 : i32
    %c0_i32_0 = arith.constant 0 : i32
    return %arg0, %c0_i32 : i32, i32
  }
  func.func @transform_1(%arg0: i32) -> (i32, i32) {
    %c0_i32 = arith.constant 0 : i32
    %c0_i32_0 = arith.constant 0 : i32
    return %arg0, %c0_i32 : i32, i32
  }
  func.func @transform_2(%arg0: i32) -> (i32, i32) {
    %c0_i32 = arith.constant 0 : i32
    %c0_i32_0 = arith.constant 0 : i32
    %c0_i32_1 = arith.constant 0 : i32
    return %c0_i32, %c0_i32_0 : i32, i32
  }
  func.func @transform_3(%arg0: i32) -> (i32, i32) {
    %c0_i32 = arith.constant 0 : i32
    %c0_i32_0 = arith.constant 0 : i32
    %c0_i32_1 = arith.constant 0 : i32
    return %c0_i32, %c0_i32_0 : i32, i32
  }
  func.func @transform_4(%arg0: i32) -> (i32, i32) {
    %c0_i32 = arith.constant 0 : i32
    %c0_i32_0 = arith.constant 0 : i32
    %c0_i32_1 = arith.constant 0 : i32
    return %c0_i32, %c0_i32_0 : i32, i32
  }
  func.func @transform_5(%arg0: i32) -> (i32, i32) {
    %c0_i32 = arith.constant 0 : i32
    %c0_i32_0 = arith.constant 0 : i32
    %c0_i32_1 = arith.constant 0 : i32
    return %c0_i32, %c0_i32_0 : i32, i32
  }
  func.func @transform_6(%arg0: i32) -> (i32, i32) {
    %c0_i32 = arith.constant 0 : i32
    %c0_i32_0 = arith.constant 0 : i32
    %c0_i32_1 = arith.constant 0 : i32
    return %c0_i32, %c0_i32_0 : i32, i32
  }
  func.func @transform_7(%arg0: i32) -> (i32, i32) {
    %c0_i32 = arith.constant 0 : i32
    %c0_i32_0 = arith.constant 0 : i32
    %c0_i32_1 = arith.constant 0 : i32
    return %c0_i32, %c0_i32_0 : i32, i32
  }
  func.func @transform_8(%arg0: i32) -> (i32, i32) {
    %c0_i32 = arith.constant 0 : i32
    %c0_i32_0 = arith.constant 0 : i32
    %c0_i32_1 = arith.constant 0 : i32
    return %c0_i32, %c0_i32_0 : i32, i32
  }
  func.func @transform_9(%arg0: i32) -> (i32, i32) {
    %c0_i32 = arith.constant 0 : i32
    %c0_i32_0 = arith.constant 0 : i32
    %c0_i32_1 = arith.constant 0 : i32
    return %c0_i32, %c0_i32_0 : i32, i32
  }
  func.func @transform_10(%arg0: i32) -> (i32, i32) {
    %c0_i32 = arith.constant 0 : i32
    %c0_i32_0 = arith.constant 0 : i32
    %c0_i32_1 = arith.constant 0 : i32
    return %c0_i32, %c0_i32_0 : i32, i32
  }
  func.func @transform_11(%arg0: i32) -> (i32, i32) {
    %c0_i32 = arith.constant 0 : i32
    %c0_i32_0 = arith.constant 0 : i32
    %c0_i32_1 = arith.constant 0 : i32
    return %c0_i32, %c0_i32_0 : i32, i32
  }
  func.func @transform_12(%arg0: i32) -> (i32, i32) {
    %c0_i32 = arith.constant 0 : i32
    %c0_i32_0 = arith.constant 0 : i32
    %c0_i32_1 = arith.constant 0 : i32
    return %c0_i32, %c0_i32_0 : i32, i32
  }
  func.func @transform_13(%arg0: i32) -> (i32, i32) {
    %c0_i32 = arith.constant 0 : i32
    %c0_i32_0 = arith.constant 0 : i32
    %c0_i32_1 = arith.constant 0 : i32
    return %c0_i32, %c0_i32_0 : i32, i32
  }
  func.func @transform_14(%arg0: i32) -> (i32, i32) {
    %c0_i32 = arith.constant 0 : i32
    %c0_i32_0 = arith.constant 0 : i32
    return %arg0, %c0_i32 : i32, i32
  }
  func.func @transform_15(%arg0: i32) -> (i32, i32) {
    %c0_i32 = arith.constant 0 : i32
    %c0_i32_0 = arith.constant 0 : i32
    return %arg0, %c0_i32 : i32, i32
  }
  func.func @transform_16(%arg0: i32) -> (i32, i32) {
    %c0_i32 = arith.constant 0 : i32
    %c0_i32_0 = arith.constant 0 : i32
    return %arg0, %c0_i32 : i32, i32
  }
}

module attributes {stable_mosaic.version = 11 : i64} {
  func.func @_vae_fcl_kernel(%arg0: i32, %arg1: memref<8x16xf32, #tpu.memory_space<vmem>>, %arg2: memref<8x32xf32, #tpu.memory_space<vmem>>, %arg3: memref<32x64xbf16, #tpu.memory_space<vmem>>, %arg4: memref<1x64xf32, #tpu.memory_space<vmem>>, %arg5: memref<64x32xbf16, #tpu.memory_space<vmem>>, %arg6: memref<1x32xf32, #tpu.memory_space<vmem>>, %arg7: memref<32x32xbf16, #tpu.memory_space<vmem>>, %arg8: memref<1x32xf32, #tpu.memory_space<vmem>>, %arg9: memref<16x32xbf16, #tpu.memory_space<vmem>>, %arg10: memref<1x32xf32, #tpu.memory_space<vmem>>, %arg11: memref<32x64xbf16, #tpu.memory_space<vmem>>, %arg12: memref<1x64xf32, #tpu.memory_space<vmem>>, %arg13: memref<64x32xbf16, #tpu.memory_space<vmem>>, %arg14: memref<1x32xf32, #tpu.memory_space<vmem>>, %arg15: memref<8x32xbf16, #tpu.memory_space<vmem>>, %arg16: memref<8x16xf32, #tpu.memory_space<vmem>>, %arg17: memref<8x16xf32, #tpu.memory_space<vmem>>) attributes {dimension_semantics = [#tpu.dimension_semantics<parallel>], iteration_bounds = array<i64: 1>, scalar_prefetch = 0 : i64, scratch_operands = 0 : i64, tpu.core_type = #tpu.core_type<tc>, window_params = [{transform_indices = @transform_0, window_bounds = array<i64: 8, 16>}, {transform_indices = @transform_1, window_bounds = array<i64: 8, 32>}, {pipeline_mode = #tpu.pipeline_mode<synchronous>, transform_indices = @transform_2, window_bounds = array<i64: 32, 64>}, {pipeline_mode = #tpu.pipeline_mode<synchronous>, transform_indices = @transform_3, window_bounds = array<i64: 1, 64>}, {pipeline_mode = #tpu.pipeline_mode<synchronous>, transform_indices = @transform_4, window_bounds = array<i64: 64, 32>}, {pipeline_mode = #tpu.pipeline_mode<synchronous>, transform_indices = @transform_5, window_bounds = array<i64: 1, 32>}, {pipeline_mode = #tpu.pipeline_mode<synchronous>, transform_indices = @transform_6, window_bounds = array<i64: 32, 32>}, {pipeline_mode = #tpu.pipeline_mode<synchronous>, transform_indices = @transform_7, window_bounds = array<i64: 1, 32>}, {pipeline_mode = #tpu.pipeline_mode<synchronous>, transform_indices = @transform_8, window_bounds = array<i64: 16, 32>}, {pipeline_mode = #tpu.pipeline_mode<synchronous>, transform_indices = @transform_9, window_bounds = array<i64: 1, 32>}, {pipeline_mode = #tpu.pipeline_mode<synchronous>, transform_indices = @transform_10, window_bounds = array<i64: 32, 64>}, {pipeline_mode = #tpu.pipeline_mode<synchronous>, transform_indices = @transform_11, window_bounds = array<i64: 1, 64>}, {pipeline_mode = #tpu.pipeline_mode<synchronous>, transform_indices = @transform_12, window_bounds = array<i64: 64, 32>}, {pipeline_mode = #tpu.pipeline_mode<synchronous>, transform_indices = @transform_13, window_bounds = array<i64: 1, 32>}, {transform_indices = @transform_14, window_bounds = array<i64: 8, 32>}, {transform_indices = @transform_15, window_bounds = array<i64: 8, 16>}, {transform_indices = @transform_16, window_bounds = array<i64: 8, 16>}]} {
    %c0 = arith.constant 0 : index
    %c0_0 = arith.constant 0 : index
    %0 = vector.load %arg2[%c0, %c0_0] : memref<8x32xf32, #tpu.memory_space<vmem>>, vector<8x32xf32>
    %1 = arith.truncf %0 : vector<8x32xf32> to vector<8x32xbf16>
    %c0_1 = arith.constant 0 : index
    %c0_2 = arith.constant 0 : index
    %2 = vector.load %arg3[%c0_1, %c0_2] : memref<32x64xbf16, #tpu.memory_space<vmem>>, vector<32x64xbf16>
    %cst = arith.constant dense<0.000000e+00> : vector<8x64xf32>
    %3 = tpu.matmul %1, %2, %cst {dimension_numbers = #tpu.dot_dimension_numbers<[1], [0], [0], [1], [0, 0, 1, 1], [], []>} : vector<8x32xbf16>, vector<32x64xbf16>, vector<8x64xf32> -> vector<8x64xf32>
    %c0_3 = arith.constant 0 : index
    %c0_4 = arith.constant 0 : index
    %4 = vector.load %arg4[%c0_3, %c0_4] : memref<1x64xf32, #tpu.memory_space<vmem>>, vector<1x64xf32>
    %5 = vector.broadcast %4 : vector<1x64xf32> to vector<8x64xf32>
    %6 = arith.addf %3, %5 : vector<8x64xf32>
    %cst_5 = arith.constant 0.000000e+00 : f32
    %7 = vector.broadcast %cst_5 : f32 to vector<8x64xf32>
    %8 = arith.maximumf %6, %7 : vector<8x64xf32>
    %9 = arith.truncf %8 : vector<8x64xf32> to vector<8x64xbf16>
    %c0_6 = arith.constant 0 : index
    %c0_7 = arith.constant 0 : index
    %10 = vector.load %arg5[%c0_6, %c0_7] : memref<64x32xbf16, #tpu.memory_space<vmem>>, vector<64x32xbf16>
    %cst_8 = arith.constant dense<0.000000e+00> : vector<8x32xf32>
    %11 = tpu.matmul %9, %10, %cst_8 {dimension_numbers = #tpu.dot_dimension_numbers<[1], [0], [0], [1], [0, 0, 1, 1], [], []>} : vector<8x64xbf16>, vector<64x32xbf16>, vector<8x32xf32> -> vector<8x32xf32>
    %c0_9 = arith.constant 0 : index
    %c0_10 = arith.constant 0 : index
    %12 = vector.load %arg6[%c0_9, %c0_10] : memref<1x32xf32, #tpu.memory_space<vmem>>, vector<1x32xf32>
    %13 = vector.broadcast %12 : vector<1x32xf32> to vector<8x32xf32>
    %14 = arith.addf %11, %13 : vector<8x32xf32>
    %cst_11 = arith.constant 0.000000e+00 : f32
    %15 = vector.broadcast %cst_11 : f32 to vector<8x32xf32>
    %16 = arith.maximumf %14, %15 : vector<8x32xf32>
    %17 = arith.truncf %16 : vector<8x32xf32> to vector<8x32xbf16>
    %c0_12 = arith.constant 0 : index
    %c0_13 = arith.constant 0 : index
    %18 = vector.load %arg7[%c0_12, %c0_13] : memref<32x32xbf16, #tpu.memory_space<vmem>>, vector<32x32xbf16>
    %cst_14 = arith.constant dense<0.000000e+00> : vector<8x32xf32>
    %19 = tpu.matmul %17, %18, %cst_14 {dimension_numbers = #tpu.dot_dimension_numbers<[1], [0], [0], [1], [0, 0, 1, 1], [], []>} : vector<8x32xbf16>, vector<32x32xbf16>, vector<8x32xf32> -> vector<8x32xf32>
    %c0_15 = arith.constant 0 : index
    %c0_16 = arith.constant 0 : index
    %20 = vector.load %arg8[%c0_15, %c0_16] : memref<1x32xf32, #tpu.memory_space<vmem>>, vector<1x32xf32>
    %21 = vector.broadcast %20 : vector<1x32xf32> to vector<8x32xf32>
    %22 = arith.addf %19, %21 : vector<8x32xf32>
    %23 = vector.extract_strided_slice %22 {offsets = [0, 0], sizes = [8, 16], strides = [1, 1]} : vector<8x32xf32> to vector<8x16xf32>
    %24 = vector.extract_strided_slice %22 {offsets = [0, 16], sizes = [8, 16], strides = [1, 1]} : vector<8x32xf32> to vector<8x16xf32>
    %c0_17 = arith.constant 0 : index
    %c0_18 = arith.constant 0 : index
    %25 = vector.load %arg1[%c0_17, %c0_18] : memref<8x16xf32, #tpu.memory_space<vmem>>, vector<8x16xf32>
    %cst_19 = arith.constant 5.000000e-01 : f32
    %26 = vector.broadcast %cst_19 : f32 to vector<8x16xf32>
    %27 = arith.mulf %26, %24 : vector<8x16xf32>
    %28 = math.exp %27 : vector<8x16xf32>
    %29 = arith.mulf %25, %28 : vector<8x16xf32>
    %30 = arith.addf %23, %29 : vector<8x16xf32>
    %31 = arith.truncf %30 : vector<8x16xf32> to vector<8x16xbf16>
    %c0_20 = arith.constant 0 : index
    %c0_21 = arith.constant 0 : index
    %32 = vector.load %arg9[%c0_20, %c0_21] : memref<16x32xbf16, #tpu.memory_space<vmem>>, vector<16x32xbf16>
    %cst_22 = arith.constant dense<0.000000e+00> : vector<8x32xf32>
    %33 = tpu.matmul %31, %32, %cst_22 {dimension_numbers = #tpu.dot_dimension_numbers<[1], [0], [0], [1], [0, 0, 1, 1], [], []>} : vector<8x16xbf16>, vector<16x32xbf16>, vector<8x32xf32> -> vector<8x32xf32>
    %c0_23 = arith.constant 0 : index
    %c0_24 = arith.constant 0 : index
    %34 = vector.load %arg10[%c0_23, %c0_24] : memref<1x32xf32, #tpu.memory_space<vmem>>, vector<1x32xf32>
    %35 = vector.broadcast %34 : vector<1x32xf32> to vector<8x32xf32>
    %36 = arith.addf %33, %35 : vector<8x32xf32>
    %cst_25 = arith.constant 0.000000e+00 : f32
    %37 = vector.broadcast %cst_25 : f32 to vector<8x32xf32>
    %38 = arith.maximumf %36, %37 : vector<8x32xf32>
    %39 = arith.truncf %38 : vector<8x32xf32> to vector<8x32xbf16>
    %c0_26 = arith.constant 0 : index
    %c0_27 = arith.constant 0 : index
    %40 = vector.load %arg11[%c0_26, %c0_27] : memref<32x64xbf16, #tpu.memory_space<vmem>>, vector<32x64xbf16>
    %cst_28 = arith.constant dense<0.000000e+00> : vector<8x64xf32>
    %41 = tpu.matmul %39, %40, %cst_28 {dimension_numbers = #tpu.dot_dimension_numbers<[1], [0], [0], [1], [0, 0, 1, 1], [], []>} : vector<8x32xbf16>, vector<32x64xbf16>, vector<8x64xf32> -> vector<8x64xf32>
    %c0_29 = arith.constant 0 : index
    %c0_30 = arith.constant 0 : index
    %42 = vector.load %arg12[%c0_29, %c0_30] : memref<1x64xf32, #tpu.memory_space<vmem>>, vector<1x64xf32>
    %43 = vector.broadcast %42 : vector<1x64xf32> to vector<8x64xf32>
    %44 = arith.addf %41, %43 : vector<8x64xf32>
    %cst_31 = arith.constant 0.000000e+00 : f32
    %45 = vector.broadcast %cst_31 : f32 to vector<8x64xf32>
    %46 = arith.maximumf %44, %45 : vector<8x64xf32>
    %47 = arith.truncf %46 : vector<8x64xf32> to vector<8x64xbf16>
    %c0_32 = arith.constant 0 : index
    %c0_33 = arith.constant 0 : index
    %48 = vector.load %arg13[%c0_32, %c0_33] : memref<64x32xbf16, #tpu.memory_space<vmem>>, vector<64x32xbf16>
    %cst_34 = arith.constant dense<0.000000e+00> : vector<8x32xf32>
    %49 = tpu.matmul %47, %48, %cst_34 {dimension_numbers = #tpu.dot_dimension_numbers<[1], [0], [0], [1], [0, 0, 1, 1], [], []>} : vector<8x64xbf16>, vector<64x32xbf16>, vector<8x32xf32> -> vector<8x32xf32>
    %c0_35 = arith.constant 0 : index
    %c0_36 = arith.constant 0 : index
    %50 = vector.load %arg14[%c0_35, %c0_36] : memref<1x32xf32, #tpu.memory_space<vmem>>, vector<1x32xf32>
    %51 = vector.broadcast %50 : vector<1x32xf32> to vector<8x32xf32>
    %52 = arith.addf %49, %51 : vector<8x32xf32>
    %53 = arith.truncf %52 : vector<8x32xf32> to vector<8x32xbf16>
    %c0_37 = arith.constant 0 : index
    %c0_38 = arith.constant 0 : index
    %54 = vector.load %arg15[%c0_37, %c0_38] : memref<8x32xbf16, #tpu.memory_space<vmem>>, vector<8x32xbf16>
    tpu.vector_store %arg15[%c0_37, %c0_38], %53 {strides = array<i32>} : memref<8x32xbf16, #tpu.memory_space<vmem>>, vector<8x32xbf16>,
    %c0_39 = arith.constant 0 : index
    %c0_40 = arith.constant 0 : index
    %55 = vector.load %arg16[%c0_39, %c0_40] : memref<8x16xf32, #tpu.memory_space<vmem>>, vector<8x16xf32>
    tpu.vector_store %arg16[%c0_39, %c0_40], %23 {strides = array<i32>} : memref<8x16xf32, #tpu.memory_space<vmem>>, vector<8x16xf32>,
    %c0_41 = arith.constant 0 : index
    %c0_42 = arith.constant 0 : index
    %56 = vector.load %arg17[%c0_41, %c0_42] : memref<8x16xf32, #tpu.memory_space<vmem>>, vector<8x16xf32>
    tpu.vector_store %arg17[%c0_41, %c0_42], %24 {strides = array<i32>} : memref<8x16xf32, #tpu.memory_space<vmem>>, vector<8x16xf32>,
    return
  }
  func.func @transform_0(%arg0: i32) -> (i32, i32) {
    %c0_i32 = arith.constant 0 : i32
    %c0_i32_0 = arith.constant 0 : i32
    return %arg0, %c0_i32 : i32, i32
  }
  func.func @transform_1(%arg0: i32) -> (i32, i32) {
    %c0_i32 = arith.constant 0 : i32
    %c0_i32_0 = arith.constant 0 : i32
    return %arg0, %c0_i32 : i32, i32
  }
  func.func @transform_2(%arg0: i32) -> (i32, i32) {
    %c0_i32 = arith.constant 0 : i32
    %c0_i32_0 = arith.constant 0 : i32
    %c0_i32_1 = arith.constant 0 : i32
    return %c0_i32, %c0_i32_0 : i32, i32
  }
  func.func @transform_3(%arg0: i32) -> (i32, i32) {
    %c0_i32 = arith.constant 0 : i32
    %c0_i32_0 = arith.constant 0 : i32
    %c0_i32_1 = arith.constant 0 : i32
    return %c0_i32, %c0_i32_0 : i32, i32
  }
  func.func @transform_4(%arg0: i32) -> (i32, i32) {
    %c0_i32 = arith.constant 0 : i32
    %c0_i32_0 = arith.constant 0 : i32
    %c0_i32_1 = arith.constant 0 : i32
    return %c0_i32, %c0_i32_0 : i32, i32
  }
  func.func @transform_5(%arg0: i32) -> (i32, i32) {
    %c0_i32 = arith.constant 0 : i32
    %c0_i32_0 = arith.constant 0 : i32
    %c0_i32_1 = arith.constant 0 : i32
    return %c0_i32, %c0_i32_0 : i32, i32
  }
  func.func @transform_6(%arg0: i32) -> (i32, i32) {
    %c0_i32 = arith.constant 0 : i32
    %c0_i32_0 = arith.constant 0 : i32
    %c0_i32_1 = arith.constant 0 : i32
    return %c0_i32, %c0_i32_0 : i32, i32
  }
  func.func @transform_7(%arg0: i32) -> (i32, i32) {
    %c0_i32 = arith.constant 0 : i32
    %c0_i32_0 = arith.constant 0 : i32
    %c0_i32_1 = arith.constant 0 : i32
    return %c0_i32, %c0_i32_0 : i32, i32
  }
  func.func @transform_8(%arg0: i32) -> (i32, i32) {
    %c0_i32 = arith.constant 0 : i32
    %c0_i32_0 = arith.constant 0 : i32
    %c0_i32_1 = arith.constant 0 : i32
    return %c0_i32, %c0_i32_0 : i32, i32
  }
  func.func @transform_9(%arg0: i32) -> (i32, i32) {
    %c0_i32 = arith.constant 0 : i32
    %c0_i32_0 = arith.constant 0 : i32
    %c0_i32_1 = arith.constant 0 : i32
    return %c0_i32, %c0_i32_0 : i32, i32
  }
  func.func @transform_10(%arg0: i32) -> (i32, i32) {
    %c0_i32 = arith.constant 0 : i32
    %c0_i32_0 = arith.constant 0 : i32
    %c0_i32_1 = arith.constant 0 : i32
    return %c0_i32, %c0_i32_0 : i32, i32
  }
  func.func @transform_11(%arg0: i32) -> (i32, i32) {
    %c0_i32 = arith.constant 0 : i32
    %c0_i32_0 = arith.constant 0 : i32
    %c0_i32_1 = arith.constant 0 : i32
    return %c0_i32, %c0_i32_0 : i32, i32
  }
  func.func @transform_12(%arg0: i32) -> (i32, i32) {
    %c0_i32 = arith.constant 0 : i32
    %c0_i32_0 = arith.constant 0 : i32
    %c0_i32_1 = arith.constant 0 : i32
    return %c0_i32, %c0_i32_0 : i32, i32
  }
  func.func @transform_13(%arg0: i32) -> (i32, i32) {
    %c0_i32 = arith.constant 0 : i32
    %c0_i32_0 = arith.constant 0 : i32
    %c0_i32_1 = arith.constant 0 : i32
    return %c0_i32, %c0_i32_0 : i32, i32
  }
  func.func @transform_14(%arg0: i32) -> (i32, i32) {
    %c0_i32 = arith.constant 0 : i32
    %c0_i32_0 = arith.constant 0 : i32
    return %arg0, %c0_i32 : i32, i32
  }
  func.func @transform_15(%arg0: i32) -> (i32, i32) {
    %c0_i32 = arith.constant 0 : i32
    %c0_i32_0 = arith.constant 0 : i32
    return %arg0, %c0_i32 : i32, i32
  }
  func.func @transform_16(%arg0: i32) -> (i32, i32) {
    %c0_i32 = arith.constant 0 : i32
    %c0_i32_0 = arith.constant 0 : i32
    return %arg0, %c0_i32 : i32, i32
  }
}

</mosaic_0001>

<bundles_post_ra>
// kernel: vae_fcl_forward.1
= control target key start
LH: loop header
LB: loop body
LE: loop exit
PB: predicated region body
PF: predicated region fallthrough
CT: control target
= control target key end

     0   :  { %s909_s0 = inlined_call_operand.vmem [shape: f32[8,16], index: 0, kind: input, shape index: {}]   ;;  %s910_s1 = inlined_call_operand.vmem [shape: f32[8,32], index: 1, kind: input, shape index: {}]   ;;  %s911_s2 = inlined_call_operand.vmem [shape: bf16[32,64], index: 2, kind: input, shape index: {}]   ;;  %s912_s3 = inlined_call_operand.vmem [shape: f32[1,64], index: 3, kind: input, shape index: {}]   ;;  %s913_s4 = inlined_call_operand.vmem [shape: bf16[64,32], index: 4, kind: input, shape index: {}]   ;;  %s914_s5 = inlined_call_operand.vmem [shape: f32[1,32], index: 5, kind: input, shape index: {}]   ;;  %s915_s6 = inlined_call_operand.vmem [shape: bf16[32,32], index: 6, kind: input, shape index: {}]   ;;  %s916_s7 = inlined_call_operand.vmem [shape: f32[1,32], index: 7, kind: input, shape index: {}]   ;;  %s917_s8 = inlined_call_operand.vmem [shape: bf16[16,32], index: 8, kind: input, shape index: {}]   ;;  %s918_s9 = inlined_call_operand.vmem [shape: f32[1,32], index: 9, kind: input, shape index: {}]   ;;  %s919_s10 = inlined_call_operand.vmem [shape: bf16[32,64], index: 10, kind: input, shape index: {}]   ;;  %s920_s11 = inlined_call_operand.vmem [shape: f32[1,64], index: 11, kind: input, shape index: {}]   ;;  %s921_s12 = inlined_call_operand.vmem [shape: bf16[64,32], index: 12, kind: input, shape index: {}]   ;;  %s922_s13 = inlined_call_operand.vmem [shape: f32[1,32], index: 13, kind: input, shape index: {}]   ;;  %s923_s14 = inlined_call_operand.vmem [shape: bf16[8,32], index: 14, kind: output, shape index: {0}]   ;;  %s924_s15 = inlined_call_operand.hbm [shape: f32[8,16], index: 15, kind: output, shape index: {1}]   ;;  %s925_s16 = inlined_call_operand.hbm [shape: f32[8,16], index: 16, kind: output, shape index: {2}]  }
   0x1   :  { %926 = sst [smem:[#allocation8_spill]] %s909_s0 }
   0x2   :  { %22 = vsyncpa [#allocation3], 0  ;;  %v645_v0 = vld [vmem:[%s911_s2 + $0x8] sm:$0xff]   ;;  %v706_v1 = vmov 0.0   ;;  %v646_v2 = vld [vmem:[%s911_s2] sm:$0xff]   ;;  %vm707_vm0 = vmmov 0  }
   0x3   :  { %586 = vmatprep.subr.bf16.mxu1 %v706_v1  ;;  %606 = vmatprep.subr.bf16.mxu0 %v706_v1  ;;  %v53_v3 = vld [vmem:[%s910_s1] sm:$0xff]  ;;  %vm78_vm1 = vcmask 261120   ;;  %v647_v4 = vld [vmem:[%s913_s4 + $0x18] sm:$0xff]   ;;  %v648_v6 = vld [vmem:[%s913_s4 + $0x10] sm:$0xff]  }
   0x4   :  { %587 = vmatpush3.bf16.msra.mxu1 %v645_v0  ;;  %590 = vmatprep.mubr.msk.bf16.mxu1 %vm707_vm0, %v706_v1  ;;  %v54_v5 = vpack.c.bf16 %v53_v3, %v53_v3 }
   0x5   :  { %588 = vmatprep.subr.bf16.mxu1 %v706_v1  ;;  %610 = vmatprep.mubr.msk.bf16.mxu0 %vm707_vm0, %v706_v1 }
   0x8   :  { %589 = vmatpush3.bf16.msra.mxu1 %v646_v2 }
   0x9   :  { %594 = vmatprep.subr.bf16.mxu1 %v706_v1 }
   0xb   :  { %591 = vmatmul.mubr.msk.bf16.vlgmr.msra.gmra.mxu1 %vm78_vm1, %v54_v5 }
   0xc   :  { %595 = vmatpush3.bf16.msra.mxu1 %v647_v4  ;;  %602 = vmatprep.mubr.msk.bf16.mxu1 %vm707_vm0, %v706_v1 }
   0xd   :  { %596 = vmatprep.subr.bf16.mxu1 %v706_v1 }
   0xe   :  { %23 = vsyncpa [#allocation5], 0  ;;  %v649_v7 = vld [vmem:[%s913_s4 + $0x8] sm:$0xff]   ;;  %v650_v8 = vld [vmem:[%s913_s4] sm:$0xff]   ;;  %vm163_vm2 = vcmask 523264   ;;  %vm301_vm3 = vcmask 130048  }
   0xf   :  { %v538_v9 = vld [vmem:[%s912_s3] ss:$0 sm:$0xff]  ;;  %v651_v17 = vld [vmem:[%s915_s6 + $0x8] sm:$0xff]   ;;  %s927_s2 = sld [smem:[#allocation8_spill]]  ;;  %v656_v45 = vld [vmem:[%s921_s12 + $0x18] sm:$0xff]   ;;  %s709_s23 = smov [#allocation2]  }
  0x10   :  { %597 = vmatpush3.bf16.msra.mxu1 %v648_v6  ;;  %607 = vmatpush3.bf16.msra.mxu0 %v651_v17  ;;  %v652_v18 = vld [vmem:[%s915_s6] sm:$0xff]   ;;  %v654_v36 = vld [vmem:[%s919_s10 + $0x8] sm:$0xff]   ;;  %v657_v46 = vld [vmem:[%s921_s12 + $0x10] sm:$0xff]   ;;  %s514_s6 = sshll.u32 %s709_s23, 4  ;;  %s710_s24 = smov [#allocation4]   ;;  %s515_s6 = int_to_ptr.vmem [resolvable:$true] %s514_s6 }
  0x11   :  { %598 = vmatprep.subr.bf16.mxu1 %v706_v1  ;;  %608 = vmatprep.subr.bf16.mxu0 %v706_v1  ;;  %v542_v19 = vld [vmem:[%s914_s5] ss:$0 sm:$0xff]  ;;  %v658_v55 = vld [vmem:[%s921_s12 + $0x8] sm:$0xff]   ;;  %s524_s5 = sshll.u32 %s710_s24, 4  ;;  %p667_p1 = scmp.lt.s32.totalorder %s515_s6, %s515_s6  ;;  %s525_s5 = int_to_ptr.vmem [resolvable:$true] %s524_s5 }
  0x12   :  { %v653_v27 = vld [vmem:[%s917_s8] sm:$0xff]  }
  0x13   :  { %v548_v28 = vld [vmem:[%s916_s7] ss:$0 sm:$0xff]  ;;  %s708_s7 = smov 112  }
  0x14   :  { %599 = vmatpush3.bf16.msra.mxu1 %v649_v7  ;;  %609 = vmatpush3.bf16.msra.mxu0 %v652_v18  ;;  %v655_v44 = vld [vmem:[%s919_s10] sm:$0xff]  }
  0x15   :  { %600 = vmatprep.subr.bf16.mxu1 %v706_v1  ;;  %614 = vmatprep.subr.bf16.mxu0 %v706_v1  ;;  %v275_v38 = vld [vmem:[%s927_s2] sm:$0xff] }
  0x16   :  { %v552_v47 = vld [vmem:[%s918_s9] ss:$0 sm:$0xff] }
  0x17   :  { %v659_v56 = vld [vmem:[%s921_s12] sm:$0xff]   ;;  %s662_s12 = scalar_lea.vmem %s515_s6, 128 }
  0x18   :  { %601 = vmatpush3.bf16.msra.mxu1 %v650_v8  ;;  %v555_v57 = vld [vmem:[%s920_s11] ss:$0 sm:$0xff]  ;;  %p663_p0 = scmp.ne.s32.totalorder %s515_s6, %s662_s12  ;;  %p668_p2 = scmp.lt.s32.totalorder %s662_s12, %s662_s12 }
  0x19   :  { %620 = vmatprep.subr.bf16.mxu1 %v706_v1 }
  0x1a   :  { %p669_p3 = por %p668_p2, %p667_p1 }
  0x1c   :  { %p670_p4 = pnand %p669_p3, %p663_p0 }
  0xcb   :  { %v116_v10 = vpop.f32.mrf.mxu1 }
  0xcc   :  { %v117_v11 = vadd.f32 %v538_v9, %v116_v10 }
  0xcd   :  { %v592_v12 = vpop.f32.mrf.mxu1 }
  0xce   :  { %v122_v13 = vmax.f32 %v117_v11, 0.0 }
  0xcf   :  { %v119_v14 = vpop.f32.mrf.mxu1 }
  0xd0   :  { %v123_v15 = vpack.c.bf16 %v122_v13, %v122_v13 }
  0xd1   :  { %v593_v16 = vpop.f32.mrf.mxu1 }
  0xd2   :  { %603 = vmatmul.mubr.msk.bf16.vlgmr.msra.gmra.mxu1 %vm163_vm2, %v123_v15 }
  0xd3   :  { %624 = vmatprep.mubr.msk.bf16.mxu1 %vm707_vm0, %v706_v1  ;;  %621 = vmatpush3.bf16.msra.mxu1 %v654_v36 }
  0xd4   :  { %622 = vmatprep.subr.bf16.mxu1 %v706_v1 }
  0xd7   :  { %623 = vmatpush3.bf16.msra.mxu1 %v655_v44 }
 0x192   :  { %v201_v20 = vpop.f32.mrf.mxu1 }
 0x193   :  { %v202_v21 = vadd.f32 %v542_v19, %v201_v20 }
 0x194   :  { %v604_v22 = vpop.f32.mrf.mxu1 }
 0x195   :  { %v207_v23 = vmax.f32 %v202_v21, 0.0 }
 0x196   :  { %v204_v24 = vpop.f32.mrf.mxu1 }
 0x197   :  { %v208_v25 = vpack.c.bf16 %v207_v23, %v207_v23 }
 0x198   :  { %v605_v26 = vpop.f32.mrf.mxu1 }
 0x199   :  { %611 = vmatmul.mubr.msk.bf16.vlgmr.msra.gmra.mxu0 %vm78_vm1, %v208_v25 }
 0x19a   :  { %616 = vmatprep.mubr.msk.bf16.mxu0 %vm707_vm0, %v706_v1  ;;  %615 = vmatpush3.bf16.msra.mxu0 %v653_v27 }
 0x19b   :  { %628 = vmatprep.subr.bf16.mxu0 %v706_v1 }
 0x259   :  { %v269_v29 = vpop.f32.mrf.mxu0 }
 0x25a   :  { %v270_v30 = vadd.f32 %v548_v28, %v269_v29 }
 0x25b   :  { %v612_v31 = vpop.f32.mrf.mxu0 }
 0x25c   :  { %v276_v32 = vmul.f32 0.5, %v270_v30  ;;  %500 = vst.msk [vmem:[#allocation2] sm:$0xff] %vm301_vm3, %v270_v30 }
 0x25d   :  { %v272_v33 = vpop.f32.mrf.mxu0 }
 0x25e   :  { %v277_v34 = vmul.f32 1.442695, %v276_v32 }
 0x25f   :  { %v613_v35 = vpop.f32.mrf.mxu0 }
 0x260   :  { %660 = vpow2.f32 %v277_v34 }
 0x26d   :  { %v661_v37 = vpop.eup %660 }
 0x26e   :  { %280 = vrot.lane.b32.xlu0 %v661_v37, %s708_s7 }
 0x272   :  { %502 = vrot.lane.b32.xlu0 %v270_v30, %s708_s7 }
 0x2e0   :  { %v281_v39 = vpop.permute.xlu0 %280 }
 0x2e1   :  { %v283_v40 = vmul.f32 %v281_v39, %v275_v38 }
 0x2e3   :  { %v284_v41 = vadd.f32 %v283_v40, %v270_v30 }
 0x2e4   :  { %v503_v42 = vpop.permute.xlu0 %502 }
 0x2e5   :  { %v285_v43 = vpack.c.bf16 %v284_v41, %v284_v41  ;;  %505 = vst.msk [vmem:[#allocation4] sm:$0xff] %vm301_vm3, %v503_v42 }
 0x2e7   :  { %617 = vmatmul.mubr.msk.bf16.vlgmr.msra.gmra.mxu0 %vm301_vm3, %v285_v43 }
 0x2e8   :  { %636 = vmatprep.mubr.msk.bf16.mxu0 %vm707_vm0, %v706_v1  ;;  %629 = vmatpush3.bf16.msra.mxu0 %v656_v45 }
 0x2e9   :  { %630 = vmatprep.subr.bf16.mxu0 %v706_v1 }
 0x2ec   :  { %631 = vmatpush3.bf16.msra.mxu0 %v657_v46 }
 0x2ed   :  { %632 = vmatprep.subr.bf16.mxu0 %v706_v1 }
 0x2f0   :  { %633 = vmatpush3.bf16.msra.mxu0 %v658_v55 }
 0x2f1   :  { %634 = vmatprep.subr.bf16.mxu0 %v706_v1 }
 0x2f4   :  { %635 = vmatpush3.bf16.msra.mxu0 %v659_v56 }
 0x3a7   :  { %v339_v48 = vpop.f32.mrf.mxu0 }
 0x3a8   :  { %v340_v49 = vadd.f32 %v552_v47, %v339_v48 }
 0x3a9   :  { %v618_v50 = vpop.f32.mrf.mxu0 }
 0x3aa   :  { %v345_v51 = vmax.f32 %v340_v49, 0.0 }
 0x3ab   :  { %v342_v52 = vpop.f32.mrf.mxu0 }
 0x3ac   :  { %v346_v53 = vpack.c.bf16 %v345_v51, %v345_v51 }
 0x3ad   :  { %v619_v54 = vpop.f32.mrf.mxu0 }
 0x3ae   :  { %625 = vmatmul.mubr.msk.bf16.vlgmr.msra.gmra.mxu1 %vm78_vm1, %v346_v53 }
 0x46e   :  { %v407_v58 = vpop.f32.mrf.mxu1 }
 0x46f   :  { %v408_v59 = vadd.f32 %v555_v57, %v407_v58 }
 0x470   :  { %v626_v60 = vpop.f32.mrf.mxu1 }
 0x471   :  { %v413_v61 = vmax.f32 %v408_v59, 0.0 }
 0x472   :  { %v410_v62 = vpop.f32.mrf.mxu1 }
 0x473   :  { %v414_v63 = vpack.c.bf16 %v413_v61, %v413_v61 }
 0x474   :  { %v627_v0 = vpop.f32.mrf.mxu1 }
 0x475   :  { %637 = vmatmul.mubr.msk.bf16.vlgmr.msra.gmra.mxu0 %vm163_vm2, %v414_v63 }
 0x476   :  { %673 = shalt.err (!%p670_p4)
}
 0x477   :  { %517 = dma.vmem_to_hbm [thread:$0]  %s515_s6, 128, %s924_s15, [#allocation3]  }
 0x478   :  { %s682_s26 = scalar_lea.vmem %s525_s5, 128  ;;  %p687_p6 = scmp.lt.s32.totalorder %s525_s5, %s525_s5 }
 0x479   :  { %p683_p5 = scmp.ne.s32.totalorder %s525_s5, %s682_s26  ;;  %p688_p7 = scmp.lt.s32.totalorder %s682_s26, %s682_s26 }
 0x47b   :  { %p689_p8 = por %p688_p7, %p687_p6 }
 0x47d   :  { %p690_p9 = pnand %p689_p8, %p683_p5 }
 0x47f   :  { %693 = shalt.err (!%p690_p9)
}
 0x480   :  { %527 = dma.vmem_to_hbm [thread:$0]  %s525_s5, 128, %s925_s16, [#allocation5]   ;;  %v559_v1 = vld [vmem:[%s922_s13] ss:$0 sm:$0xff]  ;;  %vm498_vm4 = vcmask 257024  }
 0x535   :  { %v491_v2 = vpop.f32.mrf.mxu0 }
 0x536   :  { %v492_v3 = vadd.f32 %v559_v1, %v491_v2 }
 0x537   :  { %v638_v4 = vpop.f32.mrf.mxu0 }
 0x538   :  { %v497_v5 = vpack.c.bf16 %v492_v3, %v492_v3 }
 0x539   :  { %v494_v6 = vpop.f32.mrf.mxu0 }
 0x53a   :  { %499 = vst.msk [vmem:[%s923_s14] sm:$0xf] %vm498_vm4, %v497_v5 }
 0x53b   :  { %v639_v7 = vpop.f32.mrf.mxu0 }
 0x53c   :  { %702 = dma.done.wait [#allocation3], 128  }
 0x53d   :  { %703 = vsyncadd [#allocation3], 4294967168 }
 0x53e   :  { %704 = dma.done.wait [#allocation5], 128  }
 0x53f   :  { %705 = vsyncadd [#allocation5], 4294967168 }
 0x540   :  { %536 = vsyncpa [#allocation3], 1 }
 0x541   :  { %537 = vsyncpa [#allocation5], 1 }

// kernel: vae_fcl_forward.1
= control target key start
LH: loop header
LB: loop body
LE: loop exit
PB: predicated region body
PF: predicated region fallthrough
CT: control target
= control target key end

     0   :  { %s909_s0 = inlined_call_operand.vmem [shape: f32[8,16], index: 0, kind: input, shape index: {}]   ;;  %s910_s1 = inlined_call_operand.vmem [shape: f32[8,32], index: 1, kind: input, shape index: {}]   ;;  %s911_s2 = inlined_call_operand.vmem [shape: bf16[32,64], index: 2, kind: input, shape index: {}]   ;;  %s912_s3 = inlined_call_operand.vmem [shape: f32[1,64], index: 3, kind: input, shape index: {}]   ;;  %s913_s4 = inlined_call_operand.vmem [shape: bf16[64,32], index: 4, kind: input, shape index: {}]   ;;  %s914_s5 = inlined_call_operand.vmem [shape: f32[1,32], index: 5, kind: input, shape index: {}]   ;;  %s915_s6 = inlined_call_operand.vmem [shape: bf16[32,32], index: 6, kind: input, shape index: {}]   ;;  %s916_s7 = inlined_call_operand.vmem [shape: f32[1,32], index: 7, kind: input, shape index: {}]   ;;  %s917_s8 = inlined_call_operand.vmem [shape: bf16[16,32], index: 8, kind: input, shape index: {}]   ;;  %s918_s9 = inlined_call_operand.vmem [shape: f32[1,32], index: 9, kind: input, shape index: {}]   ;;  %s919_s10 = inlined_call_operand.vmem [shape: bf16[32,64], index: 10, kind: input, shape index: {}]   ;;  %s920_s11 = inlined_call_operand.vmem [shape: f32[1,64], index: 11, kind: input, shape index: {}]   ;;  %s921_s12 = inlined_call_operand.vmem [shape: bf16[64,32], index: 12, kind: input, shape index: {}]   ;;  %s922_s13 = inlined_call_operand.vmem [shape: f32[1,32], index: 13, kind: input, shape index: {}]   ;;  %s923_s14 = inlined_call_operand.vmem [shape: bf16[8,32], index: 14, kind: output, shape index: {0}]   ;;  %s924_s15 = inlined_call_operand.hbm [shape: f32[8,16], index: 15, kind: output, shape index: {1}]   ;;  %s925_s16 = inlined_call_operand.hbm [shape: f32[8,16], index: 16, kind: output, shape index: {2}]  }
   0x1   :  { %926 = sst [smem:[#allocation8_spill]] %s909_s0 }
   0x2   :  { %22 = vsyncpa [#allocation3], 0  ;;  %v645_v0 = vld [vmem:[%s911_s2 + $0x8] sm:$0xff]   ;;  %v706_v1 = vmov 0.0   ;;  %v646_v2 = vld [vmem:[%s911_s2] sm:$0xff]   ;;  %vm707_vm0 = vmmov 0  }
   0x3   :  { %586 = vmatprep.subr.bf16.mxu1 %v706_v1  ;;  %606 = vmatprep.subr.bf16.mxu0 %v706_v1  ;;  %v53_v3 = vld [vmem:[%s910_s1] sm:$0xff]  ;;  %vm78_vm1 = vcmask 261120   ;;  %v647_v4 = vld [vmem:[%s913_s4 + $0x18] sm:$0xff]   ;;  %v648_v6 = vld [vmem:[%s913_s4 + $0x10] sm:$0xff]  }
   0x4   :  { %587 = vmatpush3.bf16.msra.mxu1 %v645_v0  ;;  %590 = vmatprep.mubr.msk.bf16.mxu1 %vm707_vm0, %v706_v1  ;;  %v54_v5 = vpack.c.bf16 %v53_v3, %v53_v3 }
   0x5   :  { %588 = vmatprep.subr.bf16.mxu1 %v706_v1  ;;  %610 = vmatprep.mubr.msk.bf16.mxu0 %vm707_vm0, %v706_v1 }
   0x8   :  { %589 = vmatpush3.bf16.msra.mxu1 %v646_v2 }
   0x9   :  { %594 = vmatprep.subr.bf16.mxu1 %v706_v1 }
   0xb   :  { %591 = vmatmul.mubr.msk.bf16.vlgmr.msra.gmra.mxu1 %vm78_vm1, %v54_v5 }
   0xc   :  { %595 = vmatpush3.bf16.msra.mxu1 %v647_v4  ;;  %602 = vmatprep.mubr.msk.bf16.mxu1 %vm707_vm0, %v706_v1 }
   0xd   :  { %596 = vmatprep.subr.bf16.mxu1 %v706_v1 }
   0xe   :  { %23 = vsyncpa [#allocation5], 0  ;;  %v649_v7 = vld [vmem:[%s913_s4 + $0x8] sm:$0xff]   ;;  %v650_v8 = vld [vmem:[%s913_s4] sm:$0xff]   ;;  %vm163_vm2 = vcmask 523264   ;;  %vm301_vm3 = vcmask 130048  }
   0xf   :  { %v538_v9 = vld [vmem:[%s912_s3] ss:$0 sm:$0xff]  ;;  %v651_v17 = vld [vmem:[%s915_s6 + $0x8] sm:$0xff]   ;;  %s927_s2 = sld [smem:[#allocation8_spill]]  ;;  %v656_v45 = vld [vmem:[%s921_s12 + $0x18] sm:$0xff]   ;;  %s709_s23 = smov [#allocation2]  }
  0x10   :  { %597 = vmatpush3.bf16.msra.mxu1 %v648_v6  ;;  %607 = vmatpush3.bf16.msra.mxu0 %v651_v17  ;;  %v652_v18 = vld [vmem:[%s915_s6] sm:$0xff]   ;;  %v654_v36 = vld [vmem:[%s919_s10 + $0x8] sm:$0xff]   ;;  %v657_v46 = vld [vmem:[%s921_s12 + $0x10] sm:$0xff]   ;;  %s514_s6 = sshll.u32 %s709_s23, 4  ;;  %s710_s24 = smov [#allocation4]   ;;  %s515_s6 = int_to_ptr.vmem [resolvable:$true] %s514_s6 }
  0x11   :  { %598 = vmatprep.subr.bf16.mxu1 %v706_v1  ;;  %608 = vmatprep.subr.bf16.mxu0 %v706_v1  ;;  %v542_v19 = vld [vmem:[%s914_s5] ss:$0 sm:$0xff]  ;;  %v658_v55 = vld [vmem:[%s921_s12 + $0x8] sm:$0xff]   ;;  %s524_s5 = sshll.u32 %s710_s24, 4  ;;  %p667_p1 = scmp.lt.s32.totalorder %s515_s6, %s515_s6  ;;  %s525_s5 = int_to_ptr.vmem [resolvable:$true] %s524_s5 }
  0x12   :  { %v653_v27 = vld [vmem:[%s917_s8] sm:$0xff]  }
  0x13   :  { %v548_v28 = vld [vmem:[%s916_s7] ss:$0 sm:$0xff]  ;;  %s708_s7 = smov 112  }
  0x14   :  { %599 = vmatpush3.bf16.msra.mxu1 %v649_v7  ;;  %609 = vmatpush3.bf16.msra.mxu0 %v652_v18  ;;  %v655_v44 = vld [vmem:[%s919_s10] sm:$0xff]  }
  0x15   :  { %600 = vmatprep.subr.bf16.mxu1 %v706_v1  ;;  %614 = vmatprep.subr.bf16.mxu0 %v706_v1  ;;  %v275_v38 = vld [vmem:[%s927_s2] sm:$0xff] }
  0x16   :  { %v552_v47 = vld [vmem:[%s918_s9] ss:$0 sm:$0xff] }
  0x17   :  { %v659_v56 = vld [vmem:[%s921_s12] sm:$0xff]   ;;  %s662_s12 = scalar_lea.vmem %s515_s6, 128 }
  0x18   :  { %601 = vmatpush3.bf16.msra.mxu1 %v650_v8  ;;  %v555_v57 = vld [vmem:[%s920_s11] ss:$0 sm:$0xff]  ;;  %p663_p0 = scmp.ne.s32.totalorder %s515_s6, %s662_s12  ;;  %p668_p2 = scmp.lt.s32.totalorder %s662_s12, %s662_s12 }
  0x19   :  { %620 = vmatprep.subr.bf16.mxu1 %v706_v1 }
  0x1a   :  { %p669_p3 = por %p668_p2, %p667_p1 }
  0x1c   :  { %p670_p4 = pnand %p669_p3, %p663_p0 }
  0xcb   :  { %v116_v10 = vpop.f32.mrf.mxu1 }
  0xcc   :  { %v117_v11 = vadd.f32 %v538_v9, %v116_v10 }
  0xcd   :  { %v592_v12 = vpop.f32.mrf.mxu1 }
  0xce   :  { %v122_v13 = vmax.f32 %v117_v11, 0.0 }
  0xcf   :  { %v119_v14 = vpop.f32.mrf.mxu1 }
  0xd0   :  { %v123_v15 = vpack.c.bf16 %v122_v13, %v122_v13 }
  0xd1   :  { %v593_v16 = vpop.f32.mrf.mxu1 }
  0xd2   :  { %603 = vmatmul.mubr.msk.bf16.vlgmr.msra.gmra.mxu1 %vm163_vm2, %v123_v15 }
  0xd3   :  { %624 = vmatprep.mubr.msk.bf16.mxu1 %vm707_vm0, %v706_v1  ;;  %621 = vmatpush3.bf16.msra.mxu1 %v654_v36 }
  0xd4   :  { %622 = vmatprep.subr.bf16.mxu1 %v706_v1 }
  0xd7   :  { %623 = vmatpush3.bf16.msra.mxu1 %v655_v44 }
 0x192   :  { %v201_v20 = vpop.f32.mrf.mxu1 }
 0x193   :  { %v202_v21 = vadd.f32 %v542_v19, %v201_v20 }
 0x194   :  { %v604_v22 = vpop.f32.mrf.mxu1 }
 0x195   :  { %v207_v23 = vmax.f32 %v202_v21, 0.0 }
 0x196   :  { %v204_v24 = vpop.f32.mrf.mxu1 }
 0x197   :  { %v208_v25 = vpack.c.bf16 %v207_v23, %v207_v23 }
 0x198   :  { %v605_v26 = vpop.f32.mrf.mxu1 }
 0x199   :  { %611 = vmatmul.mubr.msk.bf16.vlgmr.msra.gmra.mxu0 %vm78_vm1, %v208_v25 }
 0x19a   :  { %616 = vmatprep.mubr.msk.bf16.mxu0 %vm707_vm0, %v706_v1  ;;  %615 = vmatpush3.bf16.msra.mxu0 %v653_v27 }
 0x19b   :  { %628 = vmatprep.subr.bf16.mxu0 %v706_v1 }
 0x259   :  { %v269_v29 = vpop.f32.mrf.mxu0 }
 0x25a   :  { %v270_v30 = vadd.f32 %v548_v28, %v269_v29 }
 0x25b   :  { %v612_v31 = vpop.f32.mrf.mxu0 }
 0x25c   :  { %v276_v32 = vmul.f32 0.5, %v270_v30  ;;  %500 = vst.msk [vmem:[#allocation2] sm:$0xff] %vm301_vm3, %v270_v30 }
 0x25d   :  { %v272_v33 = vpop.f32.mrf.mxu0 }
 0x25e   :  { %v277_v34 = vmul.f32 1.442695, %v276_v32 }
 0x25f   :  { %v613_v35 = vpop.f32.mrf.mxu0 }
 0x260   :  { %660 = vpow2.f32 %v277_v34 }
 0x26d   :  { %v661_v37 = vpop.eup %660 }
 0x26e   :  { %280 = vrot.lane.b32.xlu0 %v661_v37, %s708_s7 }
 0x272   :  { %502 = vrot.lane.b32.xlu0 %v270_v30, %s708_s7 }
 0x2e0   :  { %v281_v39 = vpop.permute.xlu0 %280 }
 0x2e1   :  { %v283_v40 = vmul.f32 %v281_v39, %v275_v38 }
 0x2e3   :  { %v284_v41 = vadd.f32 %v283_v40, %v270_v30 }
 0x2e4   :  { %v503_v42 = vpop.permute.xlu0 %502 }
 0x2e5   :  { %v285_v43 = vpack.c.bf16 %v284_v41, %v284_v41  ;;  %505 = vst.msk [vmem:[#allocation4] sm:$0xff] %vm301_vm3, %v503_v42 }
 0x2e7   :  { %617 = vmatmul.mubr.msk.bf16.vlgmr.msra.gmra.mxu0 %vm301_vm3, %v285_v43 }
 0x2e8   :  { %636 = vmatprep.mubr.msk.bf16.mxu0 %vm707_vm0, %v706_v1  ;;  %629 = vmatpush3.bf16.msra.mxu0 %v656_v45 }
 0x2e9   :  { %630 = vmatprep.subr.bf16.mxu0 %v706_v1 }
 0x2ec   :  { %631 = vmatpush3.bf16.msra.mxu0 %v657_v46 }
 0x2ed   :  { %632 = vmatprep.subr.bf16.mxu0 %v706_v1 }
 0x2f0   :  { %633 = vmatpush3.bf16.msra.mxu0 %v658_v55 }
 0x2f1   :  { %634 = vmatprep.subr.bf16.mxu0 %v706_v1 }
 0x2f4   :  { %635 = vmatpush3.bf16.msra.mxu0 %v659_v56 }
 0x3a7   :  { %v339_v48 = vpop.f32.mrf.mxu0 }
 0x3a8   :  { %v340_v49 = vadd.f32 %v552_v47, %v339_v48 }
 0x3a9   :  { %v618_v50 = vpop.f32.mrf.mxu0 }
 0x3aa   :  { %v345_v51 = vmax.f32 %v340_v49, 0.0 }
 0x3ab   :  { %v342_v52 = vpop.f32.mrf.mxu0 }
 0x3ac   :  { %v346_v53 = vpack.c.bf16 %v345_v51, %v345_v51 }
 0x3ad   :  { %v619_v54 = vpop.f32.mrf.mxu0 }
 0x3ae   :  { %625 = vmatmul.mubr.msk.bf16.vlgmr.msra.gmra.mxu1 %vm78_vm1, %v346_v53 }
 0x46e   :  { %v407_v58 = vpop.f32.mrf.mxu1 }
 0x46f   :  { %v408_v59 = vadd.f32 %v555_v57, %v407_v58 }
 0x470   :  { %v626_v60 = vpop.f32.mrf.mxu1 }
 0x471   :  { %v413_v61 = vmax.f32 %v408_v59, 0.0 }
 0x472   :  { %v410_v62 = vpop.f32.mrf.mxu1 }
 0x473   :  { %v414_v63 = vpack.c.bf16 %v413_v61, %v413_v61 }
 0x474   :  { %v627_v0 = vpop.f32.mrf.mxu1 }
 0x475   :  { %637 = vmatmul.mubr.msk.bf16.vlgmr.msra.gmra.mxu0 %vm163_vm2, %v414_v63 }
 0x476   :  { %673 = shalt.err (!%p670_p4)
}
 0x477   :  { %517 = dma.vmem_to_hbm [thread:$0]  %s515_s6, 128, %s924_s15, [#allocation3]  }
 0x478   :  { %s682_s26 = scalar_lea.vmem %s525_s5, 128  ;;  %p687_p6 = scmp.lt.s32.totalorder %s525_s5, %s525_s5 }
 0x479   :  { %p683_p5 = scmp.ne.s32.totalorder %s525_s5, %s682_s26  ;;  %p688_p7 = scmp.lt.s32.totalorder %s682_s26, %s682_s26 }
 0x47b   :  { %p689_p8 = por %p688_p7, %p687_p6 }
 0x47d   :  { %p690_p9 = pnand %p689_p8, %p683_p5 }
 0x47f   :  { %693 = shalt.err (!%p690_p9)
}
 0x480   :  { %527 = dma.vmem_to_hbm [thread:$0]  %s525_s5, 128, %s925_s16, [#allocation5]   ;;  %v559_v1 = vld [vmem:[%s922_s13] ss:$0 sm:$0xff]  ;;  %vm498_vm4 = vcmask 257024  }
 0x535   :  { %v491_v2 = vpop.f32.mrf.mxu0 }
 0x536   :  { %v492_v3 = vadd.f32 %v559_v1, %v491_v2 }
 0x537   :  { %v638_v4 = vpop.f32.mrf.mxu0 }
 0x538   :  { %v497_v5 = vpack.c.bf16 %v492_v3, %v492_v3 }
 0x539   :  { %v494_v6 = vpop.f32.mrf.mxu0 }
 0x53a   :  { %499 = vst.msk [vmem:[%s923_s14] sm:$0xf] %vm498_vm4, %v497_v5 }
 0x53b   :  { %v639_v7 = vpop.f32.mrf.mxu0 }
 0x53c   :  { %702 = dma.done.wait [#allocation3], 128  }
 0x53d   :  { %703 = vsyncadd [#allocation3], 4294967168 }
 0x53e   :  { %704 = dma.done.wait [#allocation5], 128  }
 0x53f   :  { %705 = vsyncadd [#allocation5], 4294967168 }
 0x540   :  { %536 = vsyncpa [#allocation3], 1 }
 0x541   :  { %537 = vsyncpa [#allocation5], 1 }

</bundles_post_ra>
